<compile_context>
chip_gen: v7x
topology: tpu7x:2x2x1
jax: 0.10.0
libtpu: 0.0.40
codegen_flags: <defaults>
</compile_context>

<pallas_src>
import functools

import jax
import jax.numpy as jnp
from jax import lax
from jax.experimental import pallas as pl
from jax.experimental.pallas import tpu as pltpu


def _round_up(x: int, m: int) -> int:
    return (x + m - 1) // m * m


def _gelu(h, approximate: bool):
    if approximate:
        # tanh approximation: tanh lowers to the EUP slot, freeing the VALU.
        c = 0.7978845608028654  # sqrt(2/pi)
        return 0.5 * h * (1.0 + jnp.tanh(c * (h + 0.044715 * h * h * h)))
    # exact erf form, matching torch.nn.GELU() default.
    return 0.5 * h * (1.0 + lax.erf(h * 0.7071067811865475))


# --------------------------------------------------------------------------
# Kernels
# --------------------------------------------------------------------------
def _mlp_resident_kernel(x_ref, w1_ref, b1_ref, w2_ref, b2_ref, o_ref, *,
                         approximate):
    """Grid = (row_tiles,). Full weights resident in VMEM (constant block idx)."""
    x = x_ref[...].astype(w1_ref.dtype)                     # in-kernel cast
    h = jnp.dot(x, w1_ref[...], preferred_element_type=jnp.float32)
    h = _gelu(h + b1_ref[...], approximate)                 # f32 bias + GELU
    # dropout p=0.0 is the identity -> no-op
    y = jnp.dot(h.astype(w2_ref.dtype), w2_ref[...],
                preferred_element_type=jnp.float32)
    o_ref[...] = (y + b2_ref[...]).astype(o_ref.dtype)


def _mlp_tiled_kernel(x_ref, w1_ref, b1_ref, w2_ref, b2_ref, o_ref, acc_ref, *,
                      approximate):
    """Grid = (row_tiles, hidden_tiles). Hidden axis is the reduction axis."""
    h_idx = pl.program_id(1)

    @pl.when(h_idx == 0)
    def _():
        acc_ref[...] = jnp.zeros_like(acc_ref)

    x = x_ref[...].astype(w1_ref.dtype)                     # in-kernel cast
    h = jnp.dot(x, w1_ref[...], preferred_element_type=jnp.float32)
    h = _gelu(h + b1_ref[...], approximate)
    acc_ref[...] += jnp.dot(h.astype(w2_ref.dtype), w2_ref[...],
                            preferred_element_type=jnp.float32)

    @pl.when(h_idx == pl.num_programs(1) - 1)
    def _():
        o_ref[...] = (acc_ref[...] + b2_ref[...]).astype(o_ref.dtype)


# --------------------------------------------------------------------------
# Builder / wrapper
# --------------------------------------------------------------------------
def make_mlp(w1, b1, w2, b2, *, compute_dtype=jnp.bfloat16, tm=512, th=512,
             gelu_approximate=False, force_hidden_tiling=False):
    """Build an apply(x) closure for x:(B,N,C_in) -> (B,N,C_out).

    Weights are padded (lane dims to 128) and cast to `compute_dtype` exactly
    once here; biases stay f32.  C_in is intentionally left unpadded (full-
    extent blocks) so x never needs a lane-padding pass per call.
    """
    C_in, H = w1.shape
    H_w2, C_out = w2.shape
    assert H_w2 == H and b1.shape == (H,) and b2.shape == (C_out,)

    csize = jnp.dtype(compute_dtype).itemsize

    # ---- generation-aware VMEM budget ----
    try:
        cap = int(pltpu.get_tpu_info().vmem_capacity_bytes)
    except Exception:  # pragma: no cover - conservative fallback (v7x size)
        cap = 64 * 1024 * 1024
    budget = max(32 * 1024 * 1024, min(int(cap * 0.85), cap - (8 << 20)))

    tm = max(8, _round_up(tm, 8))
    C_out_p = _round_up(C_out, 128)
    H_res = _round_up(H, 128)

    # ---- resident-weights decision (weights DMA'd once for whole kernel) ----
    def _resident_bytes(tm_):
        return (2 * (C_in * H_res + H_res * C_out_p) * csize   # w1/w2 (2-buf)
                + 2 * tm_ * C_in * 4                           # x tile (f32 worst case)
                + 2 * tm_ * C_out_p * 4                        # out tile
                + 2 * tm_ * H_res * 4                          # f32 intermediate h
                + 4 * 8 * (H_res + C_out_p) * 4)               # biases + slack

    resident = (not force_hidden_tiling) and _resident_bytes(tm) <= budget

    if resident:
        H_p = H_res
        th = H_p
    else:
        th = max(128, min(_round_up(th, 128), _round_up(H, 128)))
        H_p = _round_up(H, th)

    # ---- pad + cast params ONCE (outside the per-call path) ----
    w1_p = jnp.pad(w1, ((0, 0), (0, H_p - H))).astype(compute_dtype)
    w2_p = jnp.pad(w2, ((0, H_p - H), (0, C_out_p - C_out))).astype(compute_dtype)
    b1_p = jnp.pad(b1.astype(jnp.float32), (0, H_p - H)).reshape(1, H_p)
    b2_p = jnp.pad(b2.astype(jnp.float32), (0, C_out_p - C_out)).reshape(1, C_out_p)

    @functools.partial(jax.jit, static_argnames=("tm_",))
    def _run(x2, w1c, b1c, w2c, b2c, *, tm_):
        M_p = x2.shape[0]
        out_dtype = x2.dtype
        xsize = jnp.dtype(x2.dtype).itemsize
        osize = jnp.dtype(out_dtype).itemsize
        row_tiles = M_p // tm_

        weight_bytes = (C_in * H_p + H_p * C_out_p) * csize
        cost = pl.CostEstimate(
            flops=2 * M_p * (C_in * H_p + H_p * C_out_p),
            transcendentals=(M_p * H_p) if gelu_approximate else 0,
            bytes_accessed=int(
                M_p * C_in * xsize
                + weight_bytes * (1 if resident else row_tiles)
                + M_p * C_out_p * osize
                + (H_p + C_out_p) * 4),
        )

        if resident:
            usage = (2 * (C_in * H_p + H_p * C_out_p) * csize
                     + 2 * tm_ * C_in * xsize
                     + 2 * tm_ * C_out_p * osize
                     + 2 * tm_ * H_p * 4
                     + 4 * 8 * (H_p + C_out_p) * 4)
        else:
            usage = (2 * tm_ * C_in * xsize
                     + 2 * (C_in * th + th * C_out_p) * csize
                     + 2 * tm_ * C_out_p * osize
                     + tm_ * C_out_p * 4
                     + 2 * tm_ * th * 4
                     + 4 * 8 * (th + C_out_p) * 4)
        vmem_limit = int(min(max(int(usage * 1.25), 32 * 1024 * 1024), budget))

        if resident:
            kernel = functools.partial(_mlp_resident_kernel,
                                       approximate=gelu_approximate)
            grid_spec = pltpu.PrefetchScalarGridSpec(
                num_scalar_prefetch=0,
                grid=(row_tiles,),
                in_specs=[
                    pl.BlockSpec((tm_, C_in), lambda i: (i, 0)),      # x rows
                    pl.BlockSpec((C_in, H_p), lambda i: (0, 0)),      # w1 (resident)
                    pl.BlockSpec((1, H_p), lambda i: (0, 0)),         # b1 (f32)
                    pl.BlockSpec((H_p, C_out_p), lambda i: (0, 0)),   # w2 (resident)
                    pl.BlockSpec((1, C_out_p), lambda i: (0, 0)),     # b2 (f32)
                ],
                out_specs=pl.BlockSpec((tm_, C_out_p), lambda i: (i, 0)),
            )
            dims = ("parallel",)
        else:
            kernel = functools.partial(_mlp_tiled_kernel,
                                       approximate=gelu_approximate)
            grid_spec = pltpu.PrefetchScalarGridSpec(
                num_scalar_prefetch=0,
                grid=(row_tiles, H_p // th),
                in_specs=[
                    pl.BlockSpec((tm_, C_in), lambda i, h: (i, 0)),     # x rows
                    pl.BlockSpec((C_in, th), lambda i, h: (0, h)),      # w1 slab
                    pl.BlockSpec((1, th), lambda i, h: (0, h)),         # b1 slab
                    pl.BlockSpec((th, C_out_p), lambda i, h: (h, 0)),   # w2 slab
                    pl.BlockSpec((1, C_out_p), lambda i, h: (0, 0)),    # b2
                ],
                out_specs=pl.BlockSpec((tm_, C_out_p), lambda i, h: (i, 0)),
                scratch_shapes=[pltpu.VMEM((tm_, C_out_p), jnp.float32)],
            )
            dims = ("parallel", "arbitrary")

        return pl.pallas_call(
            kernel,
            out_shape=jax.ShapeDtypeStruct((M_p, C_out_p), out_dtype),
            grid_spec=grid_spec,
            compiler_params=pltpu.CompilerParams(
                dimension_semantics=dims,
                vmem_limit_bytes=vmem_limit,
            ),
            cost_estimate=cost,
        )(x2, w1c, b1c, w2c, b2c)

    def apply(x):
        B, N, C = x.shape
        assert C == C_in
        M = B * N

        # per-call row tile selection (static: depends only on shape)
        tm_ = min(tm, _round_up(M, 8))
        if resident and M > 256 and _round_up(M, tm_) // tm_ < 2:
            # ensure >=2 row tiles so both v7x TensorCores get work
            tm_ = _round_up((M + 1) // 2, 8)
        M_p = _round_up(M, tm_)

        x2 = x.reshape(M, C_in)
        if M_p != M:
            x2 = jnp.pad(x2, ((0, M_p - M), (0, 0)))   # rows only, original dtype

        out2 = _run(x2, w1_p, b1_p, w2_p, b2_p, tm_=tm_)
        return out2[:M, :C_out].reshape(B, N, C_out)

    return apply


# --------------------------------------------------------------------------
# Params / reference
# --------------------------------------------------------------------------
def init_mlp_params(key, in_features, hidden_features, out_features,
                    dtype=jnp.float32):
    """Deterministic init mimicking nn.Linear default (uniform +/- 1/sqrt(fan_in))."""
    k1, k2, k3, k4 = jax.random.split(key, 4)
    lim1 = 1.0 / (in_features ** 0.5)
    lim2 = 1.0 / (hidden_features ** 0.5)
    w1 = jax.random.uniform(k1, (in_features, hidden_features), dtype, -lim1, lim1)
    b1 = jax.random.uniform(k2, (hidden_features,), dtype, -lim1, lim1)
    w2 = jax.random.uniform(k3, (hidden_features, out_features), dtype, -lim2, lim2)
    b2 = jax.random.uniform(k4, (out_features,), dtype, -lim2, lim2)
    return w1, b1, w2, b2


def mlp_reference(x, w1, b1, w2, b2, compute_dtype=jnp.float32):
    cd = compute_dtype
    h = jnp.dot(x.astype(cd), w1.astype(cd),
                preferred_element_type=jnp.float32) + b1
    h = 0.5 * h * (1.0 + lax.erf(h * 0.7071067811865475))
    return jnp.dot(h.astype(cd), w2.astype(cd),
                   preferred_element_type=jnp.float32) + b2


if __name__ == "__main__":
    # Small ViT-like shapes: batch=2, tokens=8, in=32, hidden=64, out=32
    B, N, C_in, H = 2, 8, 32, 64
    C_out = C_in

    key = jax.random.PRNGKey(0)
    kx, kp = jax.random.split(key)
    x = jax.random.normal(kx, (B, N, C_in), jnp.float32)
    w1, b1, w2, b2 = init_mlp_params(kp, C_in, H, C_out)

    # Resident-weights path (the common / fast path).
    mlp = make_mlp(w1, b1, w2, b2)
    out = jax.block_until_ready(mlp(x))
    assert out.shape == (B, N, C_out)

    ref_bf16 = mlp_reference(x, w1, b1, w2, b2, compute_dtype=jnp.bfloat16)
    ref_f32 = mlp_reference(x, w1, b1, w2, b2, compute_dtype=jnp.float32)
    assert jnp.allclose(out, ref_bf16, atol=2e-3, rtol=2e-3), "mismatch vs bf16 ref"
    assert jnp.allclose(out, ref_f32, atol=3e-2, rtol=3e-2), "mismatch vs f32 ref"

    # Also exercise the hidden-tiled fallback path (2 reduction steps).
    H_big = 256
    w1b, b1b, w2b, b2b = init_mlp_params(jax.random.PRNGKey(1), C_in, H_big, C_out)
    mlp_tiled = make_mlp(w1b, b1b, w2b, b2b, th=128, force_hidden_tiling=True)
    out_t = jax.block_until_ready(mlp_tiled(x))
    ref_t = mlp_reference(x, w1b, b1b, w2b, b2b, compute_dtype=jnp.bfloat16)
    assert jnp.allclose(out_t, ref_t, atol=2e-3, rtol=2e-3), "tiled path mismatch"

    print("KERNEL_OK")
</pallas_src>

<mosaic_0001>
module attributes {stable_mosaic.version = 11 : i64} {
  func.func @_mlp_resident_kernel(%arg0: i32, %arg1: memref<16x32xf32, #tpu.memory_space<vmem>>, %arg2: memref<32x128xbf16, #tpu.memory_space<vmem>>, %arg3: memref<1x128xf32, #tpu.memory_space<vmem>>, %arg4: memref<128x128xbf16, #tpu.memory_space<vmem>>, %arg5: memref<1x128xf32, #tpu.memory_space<vmem>>, %arg6: memref<16x128xf32, #tpu.memory_space<vmem>>) attributes {dimension_semantics = [#tpu.dimension_semantics<parallel>], iteration_bounds = array<i64: 1>, scalar_prefetch = 0 : i64, scratch_operands = 0 : i64, tpu.core_type = #tpu.core_type<tc>, window_params = [{transform_indices = @transform_0, window_bounds = array<i64: 16, 32>}, {pipeline_mode = #tpu.pipeline_mode<synchronous>, transform_indices = @transform_1, window_bounds = array<i64: 32, 128>}, {pipeline_mode = #tpu.pipeline_mode<synchronous>, transform_indices = @transform_2, window_bounds = array<i64: 1, 128>}, {pipeline_mode = #tpu.pipeline_mode<synchronous>, transform_indices = @transform_3, window_bounds = array<i64: 128, 128>}, {pipeline_mode = #tpu.pipeline_mode<synchronous>, transform_indices = @transform_4, window_bounds = array<i64: 1, 128>}, {transform_indices = @transform_5, window_bounds = array<i64: 16, 128>}]} {
    %c0 = arith.constant 0 : index
    %c0_0 = arith.constant 0 : index
    %0 = vector.load %arg1[%c0, %c0_0] : memref<16x32xf32, #tpu.memory_space<vmem>>, vector<16x32xf32>
    %1 = arith.truncf %0 : vector<16x32xf32> to vector<16x32xbf16>
    %c0_1 = arith.constant 0 : index
    %c0_2 = arith.constant 0 : index
    %2 = vector.load %arg2[%c0_1, %c0_2] : memref<32x128xbf16, #tpu.memory_space<vmem>>, vector<32x128xbf16>
    %cst = arith.constant dense<0.000000e+00> : vector<16x128xf32>
    %3 = tpu.matmul %1, %2, %cst {dimension_numbers = #tpu.dot_dimension_numbers<[1], [0], [0], [1], [0, 0, 1, 1], [], []>} : vector<16x32xbf16>, vector<32x128xbf16>, vector<16x128xf32> -> vector<16x128xf32>
    %c0_3 = arith.constant 0 : index
    %c0_4 = arith.constant 0 : index
    %4 = vector.load %arg3[%c0_3, %c0_4] : memref<1x128xf32, #tpu.memory_space<vmem>>, vector<1x128xf32>
    %5 = vector.broadcast %4 : vector<1x128xf32> to vector<16x128xf32>
    %6 = arith.addf %3, %5 : vector<16x128xf32>
    %cst_5 = arith.constant 5.000000e-01 : f32
    %7 = vector.broadcast %cst_5 : f32 to vector<16x128xf32>
    %8 = arith.mulf %7, %6 : vector<16x128xf32>
    %cst_6 = arith.constant 0.707106769 : f32
    %9 = vector.broadcast %cst_6 : f32 to vector<16x128xf32>
    %10 = arith.mulf %6, %9 : vector<16x128xf32>
    %11 = math.erf %10 : vector<16x128xf32>
    %cst_7 = arith.constant 1.000000e+00 : f32
    %12 = vector.broadcast %cst_7 : f32 to vector<16x128xf32>
    %13 = arith.addf %12, %11 : vector<16x128xf32>
    %14 = arith.mulf %8, %13 : vector<16x128xf32>
    %15 = arith.truncf %14 : vector<16x128xf32> to vector<16x128xbf16>
    %c0_8 = arith.constant 0 : index
    %c0_9 = arith.constant 0 : index
    %16 = vector.load %arg4[%c0_8, %c0_9] : memref<128x128xbf16, #tpu.memory_space<vmem>>, vector<128x128xbf16>
    %cst_10 = arith.constant dense<0.000000e+00> : vector<16x128xf32>
    %17 = tpu.matmul %15, %16, %cst_10 {dimension_numbers = #tpu.dot_dimension_numbers<[1], [0], [0], [1], [0, 0, 1, 1], [], []>} : vector<16x128xbf16>, vector<128x128xbf16>, vector<16x128xf32> -> vector<16x128xf32>
    %c0_11 = arith.constant 0 : index
    %c0_12 = arith.constant 0 : index
    %18 = vector.load %arg5[%c0_11, %c0_12] : memref<1x128xf32, #tpu.memory_space<vmem>>, vector<1x128xf32>
    %19 = vector.broadcast %18 : vector<1x128xf32> to vector<16x128xf32>
    %20 = arith.addf %17, %19 : vector<16x128xf32>
    %c0_13 = arith.constant 0 : index
    %c0_14 = arith.constant 0 : index
    %21 = vector.load %arg6[%c0_13, %c0_14] : memref<16x128xf32, #tpu.memory_space<vmem>>, vector<16x128xf32>
    tpu.vector_store %arg6[%c0_13, %c0_14], %20 {strides = array<i32>} : memref<16x128xf32, #tpu.memory_space<vmem>>, vector<16x128xf32>,
    return
  }
  func.func @transform_0(%arg0: i32) -> (i32, i32) {
    %c0_i32 = arith.constant 0 : i32
    %c0_i32_0 = arith.constant 0 : i32
    return %arg0, %c0_i32 : i32, i32
  }
  func.func @transform_1(%arg0: i32) -> (i32, i32) {
    %c0_i32 = arith.constant 0 : i32
    %c0_i32_0 = arith.constant 0 : i32
    %c0_i32_1 = arith.constant 0 : i32
    return %c0_i32, %c0_i32_0 : i32, i32
  }
  func.func @transform_2(%arg0: i32) -> (i32, i32) {
    %c0_i32 = arith.constant 0 : i32
    %c0_i32_0 = arith.constant 0 : i32
    %c0_i32_1 = arith.constant 0 : i32
    return %c0_i32, %c0_i32_0 : i32, i32
  }
  func.func @transform_3(%arg0: i32) -> (i32, i32) {
    %c0_i32 = arith.constant 0 : i32
    %c0_i32_0 = arith.constant 0 : i32
    %c0_i32_1 = arith.constant 0 : i32
    return %c0_i32, %c0_i32_0 : i32, i32
  }
  func.func @transform_4(%arg0: i32) -> (i32, i32) {
    %c0_i32 = arith.constant 0 : i32
    %c0_i32_0 = arith.constant 0 : i32
    %c0_i32_1 = arith.constant 0 : i32
    return %c0_i32, %c0_i32_0 : i32, i32
  }
  func.func @transform_5(%arg0: i32) -> (i32, i32) {
    %c0_i32 = arith.constant 0 : i32
    %c0_i32_0 = arith.constant 0 : i32
    return %arg0, %c0_i32 : i32, i32
  }
}

</mosaic_0001>

<bundles_post_ra>
// kernel: _run.1
= control target key start
LH: loop header
LB: loop body
LE: loop exit
PB: predicated region body
PF: predicated region fallthrough
CT: control target
= control target key end

     0   :  { %10 = vsyncpa [#allocation3], 0  ;;  %s554_s0 = inlined_call_operand.hbm [shape: f32[16,32], index: 0, kind: input, shape index: {}]   ;;  %s555_s1 = inlined_call_operand.hbm [shape: bf16[32,128], index: 1, kind: input, shape index: {}]   ;;  %s556_s2 = inlined_call_operand.vmem [shape: f32[1,128], index: 2, kind: input, shape index: {}]   ;;  %s557_s3 = inlined_call_operand.hbm [shape: bf16[128,128], index: 3, kind: input, shape index: {}]   ;;  %s558_s4 = inlined_call_operand.vmem [shape: f32[1,128], index: 4, kind: input, shape index: {}]   ;;  %s559_s5 = inlined_call_operand.hbm [shape: f32[16,128], index: 5, kind: output, shape index: {}]  }
   0x1   :  { %11 = vsyncpa [#allocation6], 0 }
   0x2   :  { %12 = vsyncpa [#allocation4], 0  ;;  %s448_s18 = smov [#allocation5]   ;;  %s354_s22 = scalar_lea.hbm %s555_s1, 256 }
   0x3   :  { %s30_s19 = sshll.u32 %s448_s18, 4  ;;  %p355_p0 = scmp.ne.s32.totalorder %s555_s1, %s354_s22  ;;  %s31_s19 = int_to_ptr.vmem [resolvable:$true] %s30_s19 }
   0x4   :  { %p358_p1 = scmp.lt.u32.totalorder %s354_s22, %s555_s1 }
   0x6   :  { %p360_p2 = pnand %p358_p1, %p355_p0 }
   0x8   :  { %363 = shalt.err (!%p360_p2)
}
   0x9   :  { %s364_s27 = scalar_lea.vmem %s31_s19, 256  ;;  %p369_p4 = scmp.lt.s32.totalorder %s31_s19, %s31_s19 }
   0xa   :  { %p365_p3 = scmp.ne.s32.totalorder %s31_s19, %s364_s27  ;;  %p370_p5 = scmp.lt.s32.totalorder %s364_s27, %s364_s27 }
   0xc   :  { %p371_p6 = por %p370_p5, %p369_p4 }
   0xe   :  { %p372_p7 = pnand %p371_p6, %p365_p3 }
  0x10   :  { %375 = shalt.err (!%p372_p7)
}
  0x11   :  { %s449_s28 = smov 64   ;;  %s450_s29 = smov 4  }
  0x12   :  { %36 = dma.hbm_to_vmem [thread:$0]  %s555_s1, 256, %s31_s19, [#allocation6], %s449_s28, %s449_s28, %s450_s29  }
  0x13   :  { %s451_s7 = smov [#allocation2]   ;;  %s376_s11 = scalar_lea.hbm %s554_s0, 256 }
  0x14   :  { %s18_s8 = sshll.u32 %s451_s7, 4  ;;  %p377_p8 = scmp.ne.s32.totalorder %s554_s0, %s376_s11  ;;  %s19_s8 = int_to_ptr.vmem [resolvable:$true] %s18_s8 }
  0x15   :  { %p380_p9 = scmp.lt.u32.totalorder %s376_s11, %s554_s0 }
  0x17   :  { %p382_p10 = pnand %p380_p9, %p377_p8 }
  0x19   :  { %385 = shalt.err (!%p382_p10)
}
  0x1a   :  { %s386_s16 = scalar_lea.vmem %s19_s8, 256  ;;  %p391_p12 = scmp.lt.s32.totalorder %s19_s8, %s19_s8 }
  0x1b   :  { %p387_p11 = scmp.ne.s32.totalorder %s19_s8, %s386_s16  ;;  %p392_p13 = scmp.lt.s32.totalorder %s386_s16, %s386_s16 }
  0x1d   :  { %p393_p0 = por %p392_p13, %p391_p12 }
  0x1f   :  { %p394_p1 = pnand %p393_p0, %p387_p11 }
  0x21   :  { %397 = shalt.err (!%p394_p1)
}
  0x22   :  { %s452_s1 = smov 128   ;;  %s453_s17 = smov 8  }
  0x23   :  { %24 = dma.hbm_to_vmem [thread:$0]  %s554_s0, 256, %s19_s8, [#allocation3], %s452_s1, %s452_s1, %s453_s17  }
  0x24   :  { %s454_s20 = smov [#allocation7]   ;;  %s398_s24 = scalar_lea.hbm %s557_s3, 1024 }
  0x25   :  { %s44_s21 = sshll.u32 %s454_s20, 4  ;;  %p399_p2 = scmp.ne.s32.totalorder %s557_s3, %s398_s24  ;;  %s45_s21 = int_to_ptr.vmem [resolvable:$true] %s44_s21 }
  0x26   :  { %p402_p3 = scmp.lt.u32.totalorder %s398_s24, %s557_s3 }
  0x28   :  { %p404_p4 = pnand %p402_p3, %p399_p2 }
  0x2a   :  { %407 = shalt.err (!%p404_p4)
}
  0x2b   :  { %s408_s6 = scalar_lea.vmem %s45_s21, 1024  ;;  %p413_p6 = scmp.lt.s32.totalorder %s45_s21, %s45_s21 }
  0x2c   :  { %p409_p5 = scmp.ne.s32.totalorder %s45_s21, %s408_s6  ;;  %p414_p7 = scmp.lt.s32.totalorder %s408_s6, %s408_s6 }
  0x2e   :  { %p415_p8 = por %p414_p7, %p413_p6 }
  0x30   :  { %p416_p9 = pnand %p415_p8, %p409_p5 }
  0x32   :  { %419 = shalt.err (!%p416_p9)
}
  0x33   :  { %50 = dma.hbm_to_vmem [thread:$0]  %s557_s3, 1024, %s45_s21, [#allocation6], %s449_s28, %s449_s28, %s450_s29  }
  0x34   :  { %442 = dma.done.wait [#allocation3], 256  }
  0x35   :  { %443 = vsyncadd [#allocation3], 4294967040 }
  0x36   :  { %444 = dma.done.wait [#allocation6], 1280  }
  0x37   :  { %445 = vsyncadd [#allocation6], 4294966016  ;;  %v455_v0 = vmov 0.0   ;;  %vm456_vm0 = vmmov 0   ;;  %v340_v1 = vld [vmem:[#allocation5] sm:$0xff]   ;;  %v341_v2 = vld [vmem:[#allocation5 + $0x8] sm:$0xff]  }
  0x38   :  { %302 = vmatprep.subr.bf16.mxu0 %v455_v0  ;;  %306 = vmatprep.mubr.msk.bf16.mxu0 %vm456_vm0, %v455_v0  ;;  %v63_v3 = vld [vmem:[#allocation2] sm:$0xff]  ;;  %v64_v4 = vld [vmem:[#allocation2 + $0x8] sm:$0xff]  ;;  %vm89_vm1 = vcmask 261120   ;;  %v344_v8 = vld [vmem:[#allocation7 + $0x10] sm:$0xff]   ;;  %s457_s8 = smov [#allocation8]  }
  0x39   :  { %310 = vmatprep.subr.bf16.mxu1 %v455_v0  ;;  %326 = vmatprep.mubr.msk.bf16.mxu1 %vm456_vm0, %v455_v0  ;;  %v342_v5 = vld [vmem:[#allocation7] sm:$0xff]   ;;  %v343_v6 = vld [vmem:[#allocation7 + $0x8] sm:$0xff]   ;;  %v65_v7 = vpack.c.bf16 %v64_v4, %v63_v3  ;;  %v345_v9 = vld [vmem:[#allocation7 + $0x18] sm:$0xff]   ;;  %s264_s9 = sshll.u32 %s457_s8, 4  ;;  %s265_s9 = int_to_ptr.vmem [resolvable:$true] %s264_s9 }
  0x3a   :  { %303 = vmatpush3.bf16.msra.mxu0 %v340_v1  ;;  %311 = vmatpush3.bf16.msra.mxu1 %v342_v5  ;;  %v346_v10 = vld [vmem:[#allocation7 + $0x20] sm:$0xff]   ;;  %v347_v11 = vld [vmem:[#allocation7 + $0x28] sm:$0xff]   ;;  %v348_v12 = vld [vmem:[#allocation7 + $0x30] sm:$0xff]   ;;  %s420_s10 = scalar_lea.vmem %s265_s9, 256  ;;  %p425_p11 = scmp.lt.s32.totalorder %s265_s9, %s265_s9 }
  0x3b   :  { %304 = vmatprep.subr.bf16.mxu0 %v455_v0  ;;  %312 = vmatprep.subr.bf16.mxu1 %v455_v0  ;;  %v349_v13 = vld [vmem:[#allocation7 + $0x38] sm:$0xff]   ;;  %v277_v14 = vld [vmem:[%s556_s2] ss:$0 sm:$0xff]  ;;  %p421_p10 = scmp.ne.s32.totalorder %s265_s9, %s420_s10  ;;  %p426_p12 = scmp.lt.s32.totalorder %s420_s10, %s420_s10 }
  0x3c   :  { %v281_v32 = vld [vmem:[%s558_s4] ss:$0 sm:$0xff] }
  0x3d   :  { %p427_p13 = por %p426_p12, %p425_p11 }
  0x3e   :  { %305 = vmatpush3.bf16.msra.mxu0 %v341_v2  ;;  %313 = vmatpush3.bf16.msra.mxu1 %v343_v6 }
  0x3f   :  { %314 = vmatprep.subr.bf16.mxu1 %v455_v0  ;;  %p428_p0 = pnand %p427_p13, %p421_p10 }
  0x41   :  { %307 = vmatmul.mubr.msk.bf16.vlgmr.msra.gmra.mrb[0].mxu0 %vm89_vm1, %v65_v7 }
  0x42   :  { %315 = vmatpush3.bf16.msra.mxu1 %v344_v8 }
  0x43   :  { %316 = vmatprep.subr.bf16.mxu1 %v455_v0 }
  0x46   :  { %317 = vmatpush3.bf16.msra.mxu1 %v345_v9 }
  0x47   :  { %318 = vmatprep.subr.bf16.mxu1 %v455_v0 }
  0x4a   :  { %319 = vmatpush3.bf16.msra.mxu1 %v346_v10 }
  0x4b   :  { %320 = vmatprep.subr.bf16.mxu1 %v455_v0 }
  0x4e   :  { %321 = vmatpush3.bf16.msra.mxu1 %v347_v11 }
  0x4f   :  { %322 = vmatprep.subr.bf16.mxu1 %v455_v0 }
  0x52   :  { %323 = vmatpush3.bf16.msra.mxu1 %v348_v12 }
  0x53   :  { %324 = vmatprep.subr.bf16.mxu1 %v455_v0 }
  0x56   :  { %325 = vmatpush3.bf16.msra.mxu1 %v349_v13 }
 0x114   :  { %v127_v15 = vpop.f32.mrb[0].mxu0 }
 0x115   :  { %v128_v16 = vadd.f32 %v277_v14, %v127_v15  ;;  %v308_v17 = vpop.f32.mrb[1].mxu0 }
 0x116   :  { %v130_v18 = vpop.f32.mrb[2].mxu0 }
 0x117   :  { %v136_v19 = vmul.f32 0.70710677, %v128_v16  ;;  %v131_v20 = vadd.f32 %v277_v14, %v130_v18  ;;  %v309_v21 = vpop.f32.mrb[3].mxu0  ;;  %v134_v26 = vmul.f32 0.5, %v128_v16 }
 0x119   :  { %350 = verf.f32 %v136_v19  ;;  %v137_v22 = vmul.f32 0.70710677, %v131_v20  ;;  %v135_v27 = vmul.f32 0.5, %v131_v20 }
 0x11b   :  { %352 = verf.f32 %v137_v22 }
 0x123   :  { %v351_v23 = vpop.eup %350 }
 0x124   :  { %v140_v24 = vadd.f32 1.0, %v351_v23 }
 0x125   :  { %v353_v25 = vpop.eup %352 }
 0x126   :  { %v141_v28 = vadd.f32 1.0, %v353_v25  ;;  %v142_v29 = vmul.f32 %v140_v24, %v134_v26 }
 0x128   :  { %v143_v30 = vmul.f32 %v141_v28, %v135_v27 }
 0x12a   :  { %v144_v31 = vpack.c.bf16 %v143_v30, %v142_v29 }
 0x12c   :  { %327 = vmatmul.mubr.bf16.vlgmr.msra.gmra.mrb[0].mxu1 %v144_v31 }
 0x1ff   :  { %v250_v33 = vpop.f32.mrb[0].mxu1 }
 0x200   :  { %v251_v34 = vadd.f32 %v281_v32, %v250_v33  ;;  %v328_v35 = vpop.f32.mrb[1].mxu1 }
 0x201   :  { %v253_v36 = vpop.f32.mrb[2].mxu1 }
 0x202   :  { %257 = vst [vmem:[#allocation8] sm:$0xff] %v251_v34  ;;  %v254_v37 = vadd.f32 %v281_v32, %v253_v36  ;;  %v329_v38 = vpop.f32.mrb[3].mxu1 }
 0x204   :  { %258 = vst [vmem:[#allocation8 + $0x8] sm:$0xff] %v254_v37 }
 0x205   :  { %431 = shalt.err (!%p428_p0)
}
 0x206   :  { %s432_s12 = scalar_lea.hbm %s559_s5, 256 }
 0x207   :  { %p433_p1 = scmp.ne.s32.totalorder %s559_s5, %s432_s12  ;;  %p436_p2 = scmp.lt.u32.totalorder %s432_s12, %s559_s5 }
 0x209   :  { %p438_p3 = pnand %p436_p2, %p433_p1 }
 0x20b   :  { %441 = shalt.err (!%p438_p3)
}
 0x20c   :  { %270 = dma.vmem_to_hbm [thread:$0]  %s265_s9, 256, %s559_s5, [#allocation4], %s452_s1, %s452_s1, %s453_s17  }
 0x20d   :  { %446 = dma.done.wait [#allocation4], 256  }
 0x20e   :  { %447 = vsyncadd [#allocation4], 4294967040 }
 0x20f   :  { %274 = vsyncpa [#allocation3], 1 }
 0x210   :  { %275 = vsyncpa [#allocation6], 1 }
 0x211   :  { %276 = vsyncpa [#allocation4], 1 }

</bundles_post_ra>
